<compile_context>
chip_gen: v5e
topology: v5e:2x2
jax: 0.10.0
libtpu: 0.0.40
codegen_flags: <defaults>
</compile_context>

<pallas_src>
import functools
import math

import jax
import jax.numpy as jnp
from jax.experimental import pallas as pl
from jax.experimental.pallas import tpu as pltpu


# ------------------- Kernel 1: fused Q/K/V projection ---------------------- #
def _qkv_proj_kernel(x_ref, y_ref, w_qk_ref, b_qk_ref, w_v_ref, b_v_ref,
                     qk_ref, v_ref):
    # One MXU pass for the packed [Q*norm_fact | K] projection of x (64 output
    # lanes instead of 2x32 lane-sparse stores), one pass for V(y).
    x = x_ref[...]
    qk_ref[...] = (
        jnp.dot(x, w_qk_ref[...], preferred_element_type=jnp.float32)
        + b_qk_ref[...]
    )
    v_ref[...] = (
        jnp.dot(y_ref[...], w_v_ref[...], preferred_element_type=jnp.float32)
        + b_v_ref[...]
    )


def qkv_projection(x2, y2, w_qk, b_qk, w_v, b_v):
    """x2, y2: (M, d_model); returns ([Q*nf | K] (M, 2*dim_k), V (M, dim_v))."""
    M, d_model = x2.shape
    two_dim_k = w_qk.shape[1]
    dim_v = w_v.shape[1]
    return pl.pallas_call(
        _qkv_proj_kernel,
        out_shape=(jax.ShapeDtypeStruct((M, two_dim_k), jnp.float32),
                   jax.ShapeDtypeStruct((M, dim_v), jnp.float32)),
        grid=(1,),
        in_specs=[
            pl.BlockSpec((M, d_model), lambda i: (0, 0)),
            pl.BlockSpec((M, d_model), lambda i: (0, 0)),
            pl.BlockSpec((d_model, two_dim_k), lambda i: (0, 0)),
            pl.BlockSpec((1, two_dim_k), lambda i: (0, 0)),
            pl.BlockSpec((d_model, dim_v), lambda i: (0, 0)),
            pl.BlockSpec((1, dim_v), lambda i: (0, 0)),
        ],
        out_specs=(
            pl.BlockSpec((M, two_dim_k), lambda i: (0, 0)),
            pl.BlockSpec((M, dim_v), lambda i: (0, 0)),
        ),
        compiler_params=pltpu.CompilerParams(
            dimension_semantics=("arbitrary",)),
    )(x2, y2, w_qk, b_qk, w_v, b_v)


# --------------------- Kernel 2: attention (all heads) --------------------- #
def _attention_kernel(q_ref, k_ref, v_ref, o_ref, *, n_heads, batch):
    # Refs: (n_heads*batch, S, dh) — the module's raw row-major head split
    # with (head, batch) merged into one leading dim.  All heads are handled
    # in this single grid step; the head loop is statically unrolled, so the
    # per-head grid-step overhead of the previous version is gone.
    for h in range(n_heads):
        lo = h * batch
        q = q_ref[lo:lo + batch]                       # (B, S, dh_k)
        k = k_ref[lo:lo + batch]
        v = v_ref[lo:lo + batch]
        # norm_fact is pre-folded into the Q projection weights (exact).
        s = jnp.einsum("bqd,bkd->bqk", q, k,
                       preferred_element_type=jnp.float32)
        # F.softmax with implicit dim on the 4-D (H, B, S, S) tensor -> dim=1
        # (the batch axis) == axis 0 of this per-head (B, S, S) block.
        m = jnp.max(s, axis=0, keepdims=True)
        e = jnp.exp(s - m)
        p = e * pl.reciprocal(jnp.sum(e, axis=0, keepdims=True), approx=True)
        o_ref[lo:lo + batch] = jnp.einsum(
            "bqk,bkd->bqd", p, v, preferred_element_type=jnp.float32)
    # TODO(synk): for realistic S this should become a flash-style tiled
    # kernel over the key axis (the nonstandard softmax-over-batch makes a
    # streaming rewrite need care).


def attention_core(q3, k3, v3, *, n_heads, batch):
    """q3/k3: (H*B, S, dh_k), v3: (H*B, S, dh_v) -> (H*B, S, dh_v)."""
    G, S, dh_k = q3.shape
    dh_v = v3.shape[-1]
    kernel = functools.partial(_attention_kernel, n_heads=n_heads, batch=batch)
    return pl.pallas_call(
        kernel,
        out_shape=jax.ShapeDtypeStruct((G, S, dh_v), jnp.float32),
        grid=(1,),
        in_specs=[
            pl.BlockSpec((G, S, dh_k), lambda i: (0, 0, 0)),
            pl.BlockSpec((G, S, dh_k), lambda i: (0, 0, 0)),
            pl.BlockSpec((G, S, dh_v), lambda i: (0, 0, 0)),
        ],
        out_specs=pl.BlockSpec((G, S, dh_v), lambda i: (0, 0, 0)),
        compiler_params=pltpu.CompilerParams(
            dimension_semantics=("arbitrary",)),
    )(q3, k3, v3)


# ----------------------- Kernel 3: output projection ----------------------- #
def _linear_kernel(x_ref, w_ref, b_ref, o_ref):
    o_ref[...] = (
        jnp.dot(x_ref[...], w_ref[...], preferred_element_type=jnp.float32)
        + b_ref[...]
    )


def linear(x2, w, b2):
    """x2: (M, d_in), w: (d_in, d_out) pre-transposed, b2: (1, d_out)."""
    M, d_in = x2.shape
    d_out = w.shape[1]
    return pl.pallas_call(
        _linear_kernel,
        out_shape=jax.ShapeDtypeStruct((M, d_out), jnp.float32),
        grid=(1,),
        in_specs=[
            pl.BlockSpec((M, d_in), lambda i: (0, 0)),
            pl.BlockSpec((d_in, d_out), lambda i: (0, 0)),
            pl.BlockSpec((1, d_out), lambda i: (0, 0)),
        ],
        out_specs=pl.BlockSpec((M, d_out), lambda i: (0, 0)),
        compiler_params=pltpu.CompilerParams(
            dimension_semantics=("arbitrary",)),
    )(x2, w, b2)


# ----------------------------- Params / packing ---------------------------- #
def init_params(key, d_model, dim_k, dim_v):
    """Deterministic nn.Linear-style init (torch layout W: (d_out, d_in))."""
    ks = jax.random.split(key, 8)

    def lin(kw, kb, d_in, d_out):
        bound = 1.0 / math.sqrt(d_in)
        w = jax.random.uniform(kw, (d_out, d_in), jnp.float32, -bound, bound)
        b = jax.random.uniform(kb, (d_out,), jnp.float32, -bound, bound)
        return w, b

    wq, bq = lin(ks[0], ks[1], d_model, dim_k)
    wk, bk = lin(ks[2], ks[3], d_model, dim_k)
    wv, bv = lin(ks[4], ks[5], d_model, dim_v)
    wo, bo = lin(ks[6], ks[7], dim_v, d_model)
    return dict(wq=wq, bq=bq, wk=wk, bk=bk, wv=wv, bv=bv, wo=wo, bo=bo)


def pack_params(params, *, d_model):
    """One-time pre-pack outside the hot path: transpose to (d_in, d_out),
    fold norm_fact=1/sqrt(d_model) into the Q projection (exact), and concat
    Wq|Wk so the shared-input projections run as a single MXU pass."""
    nf = 1.0 / math.sqrt(d_model)
    w_qk = jnp.concatenate(
        [jnp.transpose(params["wq"]) * nf, jnp.transpose(params["wk"])],
        axis=1)                                            # (d_model, 2*dim_k)
    b_qk = jnp.concatenate(
        [params["bq"] * nf, params["bk"]]).reshape(1, -1)  # (1, 2*dim_k)
    return dict(
        w_qk=w_qk, b_qk=b_qk,
        w_v=jnp.transpose(params["wv"]), b_v=params["bv"].reshape(1, -1),
        w_o=jnp.transpose(params["wo"]), b_o=params["bo"].reshape(1, -1))


# ------------------------------ Module forward ----------------------------- #
def multihead_attention_forward(packed, x, y, *, d_model, dim_k, dim_v,
                                n_heads):
    B, S, _ = x.shape
    M = B * S
    dh_k = dim_k // n_heads
    dh_v = dim_v // n_heads

    x2 = x.reshape(M, d_model)
    y2 = y.reshape(M, d_model)

    # Fused packed projection: [Q*norm_fact | K] from x, V from y (1 launch).
    qk, v2 = qkv_projection(x2, y2, packed["w_qk"], packed["b_qk"],
                            packed["w_v"], packed["b_v"])
    q2 = qk[:, :dim_k]
    k2 = qk[:, dim_k:]

    # torch: .reshape(-1, B, S, dh) — raw row-major head split.  Merging the
    # (head, batch) pair into one leading dim is flat-order preserving, so
    # these wrapper reshapes are free and keep the kernel blocks 3-D.
    q3 = q2.reshape(n_heads * B, S, dh_k)
    k3 = k2.reshape(n_heads * B, S, dh_k)
    v3 = v2.reshape(n_heads * B, S, dh_v)

    # Attention for all heads in a single grid step (1 launch).
    o3 = attention_core(q3, k3, v3, n_heads=n_heads, batch=B)  # (H*B, S, dh_v)

    # torch: .reshape(y.shape[0], y.shape[1], -1) — flat-order preserving.
    out2 = o3.reshape(M, dim_v)

    # Output projection (1 launch).
    out = linear(out2, packed["w_o"], packed["b_o"])
    return out.reshape(B, S, d_model)


if __name__ == "__main__":
    # TODO(synk): the spec's Config uses d_model=20, n_heads=2 => dim_k=10.0
    # (non-integer; nn.Linear would reject it).  TPU-friendly integral sizes
    # consistent with the module are used instead.
    B, S = 2, 8
    d_model, dim_k, dim_v, n_heads = 32, 32, 32, 4

    key = jax.random.PRNGKey(0)
    kx, kp = jax.random.split(key, 2)
    x = jax.random.normal(kx, (B, S, d_model), dtype=jnp.float32)
    y = x   # Encoder usage: self.add_norm(x, self.multihead_attention, y=x)
    params = init_params(kp, d_model, dim_k, dim_v)
    packed = pack_params(params, d_model=d_model)   # one-time, off hot path

    fwd = jax.jit(functools.partial(
        multihead_attention_forward,
        d_model=d_model, dim_k=dim_k, dim_v=dim_v, n_heads=n_heads))
    out = fwd(packed, x, y)
    jax.block_until_ready(out)
    assert out.shape == (B, S, d_model)
    assert bool(jnp.all(jnp.isfinite(out)))
    print("KERNEL_OK")
</pallas_src>

<mosaic_0001>
module attributes {stable_mosaic.version = 11 : i64} {
  func.func @_attention_kernel(%arg0: i32, %arg1: memref<8x8x8xf32, #tpu.memory_space<vmem>>, %arg2: memref<8x8x8xf32, #tpu.memory_space<vmem>>, %arg3: memref<8x8x8xf32, #tpu.memory_space<vmem>>, %arg4: memref<8x8x8xf32, #tpu.memory_space<vmem>>) attributes {dimension_semantics = [#tpu.dimension_semantics<arbitrary>], iteration_bounds = array<i64: 1>, scalar_prefetch = 0 : i64, scratch_operands = 0 : i64, tpu.core_type = #tpu.core_type<tc>, window_params = [{pipeline_mode = #tpu.pipeline_mode<synchronous>, transform_indices = @transform_0, window_bounds = array<i64: 8, 8, 8>}, {pipeline_mode = #tpu.pipeline_mode<synchronous>, transform_indices = @transform_1, window_bounds = array<i64: 8, 8, 8>}, {pipeline_mode = #tpu.pipeline_mode<synchronous>, transform_indices = @transform_2, window_bounds = array<i64: 8, 8, 8>}, {pipeline_mode = #tpu.pipeline_mode<synchronous>, transform_indices = @transform_3, window_bounds = array<i64: 8, 8, 8>}]} {
    %c0 = arith.constant 0 : index
    %c0_0 = arith.constant 0 : index
    %c0_1 = arith.constant 0 : index
    %0 = vector.load %arg1[%c0, %c0_0, %c0_1] : memref<8x8x8xf32, #tpu.memory_space<vmem>>, vector<2x8x8xf32>
    %c0_2 = arith.constant 0 : index
    %c0_3 = arith.constant 0 : index
    %c0_4 = arith.constant 0 : index
    %1 = vector.load %arg2[%c0_2, %c0_3, %c0_4] : memref<8x8x8xf32, #tpu.memory_space<vmem>>, vector<2x8x8xf32>
    %c0_5 = arith.constant 0 : index
    %c0_6 = arith.constant 0 : index
    %c0_7 = arith.constant 0 : index
    %2 = vector.load %arg3[%c0_5, %c0_6, %c0_7] : memref<8x8x8xf32, #tpu.memory_space<vmem>>, vector<2x8x8xf32>
    "tpu.trace_start"() <{level = 10 : i32, message = "bqd,bkd->bqk"}> : () -> ()
    %cst = arith.constant dense<0.000000e+00> : vector<2x8x8xf32>
    %3 = tpu.matmul %0, %1, %cst {dimension_numbers = #tpu.dot_dimension_numbers<[2], [2], [1], [1], [0, 0, 0, 1, 1, 1], [0], [0]>} : vector<2x8x8xf32>, vector<2x8x8xf32>, vector<2x8x8xf32> -> vector<2x8x8xf32>
    "tpu.trace_stop"() : () -> ()
    %cst_8 = arith.constant dense<0xFF800000> : vector<8x8xf32>
    %4 = vector.multi_reduction <maximumf>, %3, %cst_8 [0] : vector<2x8x8xf32> to vector<8x8xf32>
    %5 = vector.shape_cast %4 : vector<8x8xf32> to vector<1x8x8xf32>
    %6 = vector.broadcast %5 : vector<1x8x8xf32> to vector<2x8x8xf32>
    %7 = arith.subf %3, %6 : vector<2x8x8xf32>
    %8 = math.exp %7 : vector<2x8x8xf32>
    %cst_9 = arith.constant dense<0.000000e+00> : vector<8x8xf32>
    %9 = vector.multi_reduction <add>, %8, %cst_9 [0] : vector<2x8x8xf32> to vector<8x8xf32>
    %10 = vector.shape_cast %9 : vector<8x8xf32> to vector<1x8x8xf32>
    %11 = tpu.reciprocal %10 {approx = true} : vector<1x8x8xf32> -> vector<1x8x8xf32>
    %12 = vector.broadcast %11 : vector<1x8x8xf32> to vector<2x8x8xf32>
    %13 = arith.mulf %8, %12 : vector<2x8x8xf32>
    "tpu.trace_start"() <{level = 10 : i32, message = "bqk,bkd->bqd"}> : () -> ()
    %cst_10 = arith.constant dense<0.000000e+00> : vector<2x8x8xf32>
    %14 = tpu.matmul %13, %2, %cst_10 {dimension_numbers = #tpu.dot_dimension_numbers<[2], [1], [1], [2], [0, 0, 0, 1, 1, 2], [0], [0]>} : vector<2x8x8xf32>, vector<2x8x8xf32>, vector<2x8x8xf32> -> vector<2x8x8xf32>
    "tpu.trace_stop"() : () -> ()
    %c0_11 = arith.constant 0 : index
    %c0_12 = arith.constant 0 : index
    %c0_13 = arith.constant 0 : index
    %15 = vector.load %arg4[%c0_11, %c0_12, %c0_13] : memref<8x8x8xf32, #tpu.memory_space<vmem>>, vector<2x8x8xf32>
    tpu.vector_store %arg4[%c0_11, %c0_12, %c0_13], %14 {strides = array<i32>} : memref<8x8x8xf32, #tpu.memory_space<vmem>>, vector<2x8x8xf32>,
    %c2 = arith.constant 2 : index
    %c0_14 = arith.constant 0 : index
    %c0_15 = arith.constant 0 : index
    %16 = vector.load %arg1[%c2, %c0_14, %c0_15] : memref<8x8x8xf32, #tpu.memory_space<vmem>>, vector<2x8x8xf32>
    %c2_16 = arith.constant 2 : index
    %c0_17 = arith.constant 0 : index
    %c0_18 = arith.constant 0 : index
    %17 = vector.load %arg2[%c2_16, %c0_17, %c0_18] : memref<8x8x8xf32, #tpu.memory_space<vmem>>, vector<2x8x8xf32>
    %c2_19 = arith.constant 2 : index
    %c0_20 = arith.constant 0 : index
    %c0_21 = arith.constant 0 : index
    %18 = vector.load %arg3[%c2_19, %c0_20, %c0_21] : memref<8x8x8xf32, #tpu.memory_space<vmem>>, vector<2x8x8xf32>
    "tpu.trace_start"() <{level = 10 : i32, message = "bqd,bkd->bqk"}> : () -> ()
    %cst_22 = arith.constant dense<0.000000e+00> : vector<2x8x8xf32>
    %19 = tpu.matmul %16, %17, %cst_22 {dimension_numbers = #tpu.dot_dimension_numbers<[2], [2], [1], [1], [0, 0, 0, 1, 1, 1], [0], [0]>} : vector<2x8x8xf32>, vector<2x8x8xf32>, vector<2x8x8xf32> -> vector<2x8x8xf32>
    "tpu.trace_stop"() : () -> ()
    %cst_23 = arith.constant dense<0xFF800000> : vector<8x8xf32>
    %20 = vector.multi_reduction <maximumf>, %19, %cst_23 [0] : vector<2x8x8xf32> to vector<8x8xf32>
    %21 = vector.shape_cast %20 : vector<8x8xf32> to vector<1x8x8xf32>
    %22 = vector.broadcast %21 : vector<1x8x8xf32> to vector<2x8x8xf32>
    %23 = arith.subf %19, %22 : vector<2x8x8xf32>
    %24 = math.exp %23 : vector<2x8x8xf32>
    %cst_24 = arith.constant dense<0.000000e+00> : vector<8x8xf32>
    %25 = vector.multi_reduction <add>, %24, %cst_24 [0] : vector<2x8x8xf32> to vector<8x8xf32>
    %26 = vector.shape_cast %25 : vector<8x8xf32> to vector<1x8x8xf32>
    %27 = tpu.reciprocal %26 {approx = true} : vector<1x8x8xf32> -> vector<1x8x8xf32>
    %28 = vector.broadcast %27 : vector<1x8x8xf32> to vector<2x8x8xf32>
    %29 = arith.mulf %24, %28 : vector<2x8x8xf32>
    "tpu.trace_start"() <{level = 10 : i32, message = "bqk,bkd->bqd"}> : () -> ()
    %cst_25 = arith.constant dense<0.000000e+00> : vector<2x8x8xf32>
    %30 = tpu.matmul %29, %18, %cst_25 {dimension_numbers = #tpu.dot_dimension_numbers<[2], [1], [1], [2], [0, 0, 0, 1, 1, 2], [0], [0]>} : vector<2x8x8xf32>, vector<2x8x8xf32>, vector<2x8x8xf32> -> vector<2x8x8xf32>
    "tpu.trace_stop"() : () -> ()
    %c2_26 = arith.constant 2 : index
    %c0_27 = arith.constant 0 : index
    %c0_28 = arith.constant 0 : index
    %31 = vector.load %arg4[%c2_26, %c0_27, %c0_28] : memref<8x8x8xf32, #tpu.memory_space<vmem>>, vector<2x8x8xf32>
    tpu.vector_store %arg4[%c2_26, %c0_27, %c0_28], %30 {strides = array<i32>} : memref<8x8x8xf32, #tpu.memory_space<vmem>>, vector<2x8x8xf32>,
    %c4 = arith.constant 4 : index
    %c0_29 = arith.constant 0 : index
    %c0_30 = arith.constant 0 : index
    %32 = vector.load %arg1[%c4, %c0_29, %c0_30] : memref<8x8x8xf32, #tpu.memory_space<vmem>>, vector<2x8x8xf32>
    %c4_31 = arith.constant 4 : index
    %c0_32 = arith.constant 0 : index
    %c0_33 = arith.constant 0 : index
    %33 = vector.load %arg2[%c4_31, %c0_32, %c0_33] : memref<8x8x8xf32, #tpu.memory_space<vmem>>, vector<2x8x8xf32>
    %c4_34 = arith.constant 4 : index
    %c0_35 = arith.constant 0 : index
    %c0_36 = arith.constant 0 : index
    %34 = vector.load %arg3[%c4_34, %c0_35, %c0_36] : memref<8x8x8xf32, #tpu.memory_space<vmem>>, vector<2x8x8xf32>
    "tpu.trace_start"() <{level = 10 : i32, message = "bqd,bkd->bqk"}> : () -> ()
    %cst_37 = arith.constant dense<0.000000e+00> : vector<2x8x8xf32>
    %35 = tpu.matmul %32, %33, %cst_37 {dimension_numbers = #tpu.dot_dimension_numbers<[2], [2], [1], [1], [0, 0, 0, 1, 1, 1], [0], [0]>} : vector<2x8x8xf32>, vector<2x8x8xf32>, vector<2x8x8xf32> -> vector<2x8x8xf32>
    "tpu.trace_stop"() : () -> ()
    %cst_38 = arith.constant dense<0xFF800000> : vector<8x8xf32>
    %36 = vector.multi_reduction <maximumf>, %35, %cst_38 [0] : vector<2x8x8xf32> to vector<8x8xf32>
    %37 = vector.shape_cast %36 : vector<8x8xf32> to vector<1x8x8xf32>
    %38 = vector.broadcast %37 : vector<1x8x8xf32> to vector<2x8x8xf32>
    %39 = arith.subf %35, %38 : vector<2x8x8xf32>
    %40 = math.exp %39 : vector<2x8x8xf32>
    %cst_39 = arith.constant dense<0.000000e+00> : vector<8x8xf32>
    %41 = vector.multi_reduction <add>, %40, %cst_39 [0] : vector<2x8x8xf32> to vector<8x8xf32>
    %42 = vector.shape_cast %41 : vector<8x8xf32> to vector<1x8x8xf32>
    %43 = tpu.reciprocal %42 {approx = true} : vector<1x8x8xf32> -> vector<1x8x8xf32>
    %44 = vector.broadcast %43 : vector<1x8x8xf32> to vector<2x8x8xf32>
    %45 = arith.mulf %40, %44 : vector<2x8x8xf32>
    "tpu.trace_start"() <{level = 10 : i32, message = "bqk,bkd->bqd"}> : () -> ()
    %cst_40 = arith.constant dense<0.000000e+00> : vector<2x8x8xf32>
    %46 = tpu.matmul %45, %34, %cst_40 {dimension_numbers = #tpu.dot_dimension_numbers<[2], [1], [1], [2], [0, 0, 0, 1, 1, 2], [0], [0]>} : vector<2x8x8xf32>, vector<2x8x8xf32>, vector<2x8x8xf32> -> vector<2x8x8xf32>
    "tpu.trace_stop"() : () -> ()
    %c4_41 = arith.constant 4 : index
    %c0_42 = arith.constant 0 : index
    %c0_43 = arith.constant 0 : index
    %47 = vector.load %arg4[%c4_41, %c0_42, %c0_43] : memref<8x8x8xf32, #tpu.memory_space<vmem>>, vector<2x8x8xf32>
    tpu.vector_store %arg4[%c4_41, %c0_42, %c0_43], %46 {strides = array<i32>} : memref<8x8x8xf32, #tpu.memory_space<vmem>>, vector<2x8x8xf32>,
    %c6 = arith.constant 6 : index
    %c0_44 = arith.constant 0 : index
    %c0_45 = arith.constant 0 : index
    %48 = vector.load %arg1[%c6, %c0_44, %c0_45] : memref<8x8x8xf32, #tpu.memory_space<vmem>>, vector<2x8x8xf32>
    %c6_46 = arith.constant 6 : index
    %c0_47 = arith.constant 0 : index
    %c0_48 = arith.constant 0 : index
    %49 = vector.load %arg2[%c6_46, %c0_47, %c0_48] : memref<8x8x8xf32, #tpu.memory_space<vmem>>, vector<2x8x8xf32>
    %c6_49 = arith.constant 6 : index
    %c0_50 = arith.constant 0 : index
    %c0_51 = arith.constant 0 : index
    %50 = vector.load %arg3[%c6_49, %c0_50, %c0_51] : memref<8x8x8xf32, #tpu.memory_space<vmem>>, vector<2x8x8xf32>
    "tpu.trace_start"() <{level = 10 : i32, message = "bqd,bkd->bqk"}> : () -> ()
    %cst_52 = arith.constant dense<0.000000e+00> : vector<2x8x8xf32>
    %51 = tpu.matmul %48, %49, %cst_52 {dimension_numbers = #tpu.dot_dimension_numbers<[2], [2], [1], [1], [0, 0, 0, 1, 1, 1], [0], [0]>} : vector<2x8x8xf32>, vector<2x8x8xf32>, vector<2x8x8xf32> -> vector<2x8x8xf32>
    "tpu.trace_stop"() : () -> ()
    %cst_53 = arith.constant dense<0xFF800000> : vector<8x8xf32>
    %52 = vector.multi_reduction <maximumf>, %51, %cst_53 [0] : vector<2x8x8xf32> to vector<8x8xf32>
    %53 = vector.shape_cast %52 : vector<8x8xf32> to vector<1x8x8xf32>
    %54 = vector.broadcast %53 : vector<1x8x8xf32> to vector<2x8x8xf32>
    %55 = arith.subf %51, %54 : vector<2x8x8xf32>
    %56 = math.exp %55 : vector<2x8x8xf32>
    %cst_54 = arith.constant dense<0.000000e+00> : vector<8x8xf32>
    %57 = vector.multi_reduction <add>, %56, %cst_54 [0] : vector<2x8x8xf32> to vector<8x8xf32>
    %58 = vector.shape_cast %57 : vector<8x8xf32> to vector<1x8x8xf32>
    %59 = tpu.reciprocal %58 {approx = true} : vector<1x8x8xf32> -> vector<1x8x8xf32>
    %60 = vector.broadcast %59 : vector<1x8x8xf32> to vector<2x8x8xf32>
    %61 = arith.mulf %56, %60 : vector<2x8x8xf32>
    "tpu.trace_start"() <{level = 10 : i32, message = "bqk,bkd->bqd"}> : () -> ()
    %cst_55 = arith.constant dense<0.000000e+00> : vector<2x8x8xf32>
    %62 = tpu.matmul %61, %50, %cst_55 {dimension_numbers = #tpu.dot_dimension_numbers<[2], [1], [1], [2], [0, 0, 0, 1, 1, 2], [0], [0]>} : vector<2x8x8xf32>, vector<2x8x8xf32>, vector<2x8x8xf32> -> vector<2x8x8xf32>
    "tpu.trace_stop"() : () -> ()
    %c6_56 = arith.constant 6 : index
    %c0_57 = arith.constant 0 : index
    %c0_58 = arith.constant 0 : index
    %63 = vector.load %arg4[%c6_56, %c0_57, %c0_58] : memref<8x8x8xf32, #tpu.memory_space<vmem>>, vector<2x8x8xf32>
    tpu.vector_store %arg4[%c6_56, %c0_57, %c0_58], %62 {strides = array<i32>} : memref<8x8x8xf32, #tpu.memory_space<vmem>>, vector<2x8x8xf32>,
    return
  }
  func.func @transform_0(%arg0: i32) -> (i32, i32, i32) {
    %c0_i32 = arith.constant 0 : i32
    %c0_i32_0 = arith.constant 0 : i32
    %c0_i32_1 = arith.constant 0 : i32
    %c0_i32_2 = arith.constant 0 : i32
    return %c0_i32, %c0_i32_0, %c0_i32_1 : i32, i32, i32
  }
  func.func @transform_1(%arg0: i32) -> (i32, i32, i32) {
    %c0_i32 = arith.constant 0 : i32
    %c0_i32_0 = arith.constant 0 : i32
    %c0_i32_1 = arith.constant 0 : i32
    %c0_i32_2 = arith.constant 0 : i32
    return %c0_i32, %c0_i32_0, %c0_i32_1 : i32, i32, i32
  }
  func.func @transform_2(%arg0: i32) -> (i32, i32, i32) {
    %c0_i32 = arith.constant 0 : i32
    %c0_i32_0 = arith.constant 0 : i32
    %c0_i32_1 = arith.constant 0 : i32
    %c0_i32_2 = arith.constant 0 : i32
    return %c0_i32, %c0_i32_0, %c0_i32_1 : i32, i32, i32
  }
  func.func @transform_3(%arg0: i32) -> (i32, i32, i32) {
    %c0_i32 = arith.constant 0 : i32
    %c0_i32_0 = arith.constant 0 : i32
    %c0_i32_1 = arith.constant 0 : i32
    %c0_i32_2 = arith.constant 0 : i32
    return %c0_i32, %c0_i32_0, %c0_i32_1 : i32, i32, i32
  }
}

module attributes {stable_mosaic.version = 11 : i64} {
  func.func @_qkv_proj_kernel(%arg0: i32, %arg1: memref<16x32xf32, #tpu.memory_space<vmem>>, %arg2: memref<16x32xf32, #tpu.memory_space<vmem>>, %arg3: memref<32x64xf32, #tpu.memory_space<vmem>>, %arg4: memref<1x64xf32, #tpu.memory_space<vmem>>, %arg5: memref<32x32xf32, #tpu.memory_space<vmem>>, %arg6: memref<1x32xf32, #tpu.memory_space<vmem>>, %arg7: memref<16x64xf32, #tpu.memory_space<vmem>>, %arg8: memref<16x32xf32, #tpu.memory_space<vmem>>) attributes {dimension_semantics = [#tpu.dimension_semantics<arbitrary>], iteration_bounds = array<i64: 1>, scalar_prefetch = 0 : i64, scratch_operands = 0 : i64, tpu.core_type = #tpu.core_type<tc>, window_params = [{pipeline_mode = #tpu.pipeline_mode<synchronous>, transform_indices = @transform_0, window_bounds = array<i64: 16, 32>}, {pipeline_mode = #tpu.pipeline_mode<synchronous>, transform_indices = @transform_1, window_bounds = array<i64: 16, 32>}, {pipeline_mode = #tpu.pipeline_mode<synchronous>, transform_indices = @transform_2, window_bounds = array<i64: 32, 64>}, {pipeline_mode = #tpu.pipeline_mode<synchronous>, transform_indices = @transform_3, window_bounds = array<i64: 1, 64>}, {pipeline_mode = #tpu.pipeline_mode<synchronous>, transform_indices = @transform_4, window_bounds = array<i64: 32, 32>}, {pipeline_mode = #tpu.pipeline_mode<synchronous>, transform_indices = @transform_5, window_bounds = array<i64: 1, 32>}, {pipeline_mode = #tpu.pipeline_mode<synchronous>, transform_indices = @transform_6, window_bounds = array<i64: 16, 64>}, {pipeline_mode = #tpu.pipeline_mode<synchronous>, transform_indices = @transform_7, window_bounds = array<i64: 16, 32>}]} {
    %c0 = arith.constant 0 : index
    %c0_0 = arith.constant 0 : index
    %0 = vector.load %arg1[%c0, %c0_0] : memref<16x32xf32, #tpu.memory_space<vmem>>, vector<16x32xf32>
    %c0_1 = arith.constant 0 : index
    %c0_2 = arith.constant 0 : index
    %1 = vector.load %arg3[%c0_1, %c0_2] : memref<32x64xf32, #tpu.memory_space<vmem>>, vector<32x64xf32>
    %cst = arith.constant dense<0.000000e+00> : vector<16x64xf32>
    %2 = tpu.matmul %0, %1, %cst {dimension_numbers = #tpu.dot_dimension_numbers<[1], [0], [0], [1], [0, 0, 1, 1], [], []>} : vector<16x32xf32>, vector<32x64xf32>, vector<16x64xf32> -> vector<16x64xf32>
    %c0_3 = arith.constant 0 : index
    %c0_4 = arith.constant 0 : index
    %3 = vector.load %arg4[%c0_3, %c0_4] : memref<1x64xf32, #tpu.memory_space<vmem>>, vector<1x64xf32>
    %4 = vector.broadcast %3 : vector<1x64xf32> to vector<16x64xf32>
    %5 = arith.addf %2, %4 : vector<16x64xf32>
    %c0_5 = arith.constant 0 : index
    %c0_6 = arith.constant 0 : index
    %6 = vector.load %arg7[%c0_5, %c0_6] : memref<16x64xf32, #tpu.memory_space<vmem>>, vector<16x64xf32>
    tpu.vector_store %arg7[%c0_5, %c0_6], %5 {strides = array<i32>} : memref<16x64xf32, #tpu.memory_space<vmem>>, vector<16x64xf32>,
    %c0_7 = arith.constant 0 : index
    %c0_8 = arith.constant 0 : index
    %7 = vector.load %arg2[%c0_7, %c0_8] : memref<16x32xf32, #tpu.memory_space<vmem>>, vector<16x32xf32>
    %c0_9 = arith.constant 0 : index
    %c0_10 = arith.constant 0 : index
    %8 = vector.load %arg5[%c0_9, %c0_10] : memref<32x32xf32, #tpu.memory_space<vmem>>, vector<32x32xf32>
    %cst_11 = arith.constant dense<0.000000e+00> : vector<16x32xf32>
    %9 = tpu.matmul %7, %8, %cst_11 {dimension_numbers = #tpu.dot_dimension_numbers<[1], [0], [0], [1], [0, 0, 1, 1], [], []>} : vector<16x32xf32>, vector<32x32xf32>, vector<16x32xf32> -> vector<16x32xf32>
    %c0_12 = arith.constant 0 : index
    %c0_13 = arith.constant 0 : index
    %10 = vector.load %arg6[%c0_12, %c0_13] : memref<1x32xf32, #tpu.memory_space<vmem>>, vector<1x32xf32>
    %11 = vector.broadcast %10 : vector<1x32xf32> to vector<16x32xf32>
    %12 = arith.addf %9, %11 : vector<16x32xf32>
    %c0_14 = arith.constant 0 : index
    %c0_15 = arith.constant 0 : index
    %13 = vector.load %arg8[%c0_14, %c0_15] : memref<16x32xf32, #tpu.memory_space<vmem>>, vector<16x32xf32>
    tpu.vector_store %arg8[%c0_14, %c0_15], %12 {strides = array<i32>} : memref<16x32xf32, #tpu.memory_space<vmem>>, vector<16x32xf32>,
    return
  }
  func.func @transform_0(%arg0: i32) -> (i32, i32) {
    %c0_i32 = arith.constant 0 : i32
    %c0_i32_0 = arith.constant 0 : i32
    %c0_i32_1 = arith.constant 0 : i32
    return %c0_i32, %c0_i32_0 : i32, i32
  }
  func.func @transform_1(%arg0: i32) -> (i32, i32) {
    %c0_i32 = arith.constant 0 : i32
    %c0_i32_0 = arith.constant 0 : i32
    %c0_i32_1 = arith.constant 0 : i32
    return %c0_i32, %c0_i32_0 : i32, i32
  }
  func.func @transform_2(%arg0: i32) -> (i32, i32) {
    %c0_i32 = arith.constant 0 : i32
    %c0_i32_0 = arith.constant 0 : i32
    %c0_i32_1 = arith.constant 0 : i32
    return %c0_i32, %c0_i32_0 : i32, i32
  }
  func.func @transform_3(%arg0: i32) -> (i32, i32) {
    %c0_i32 = arith.constant 0 : i32
    %c0_i32_0 = arith.constant 0 : i32
    %c0_i32_1 = arith.constant 0 : i32
    return %c0_i32, %c0_i32_0 : i32, i32
  }
  func.func @transform_4(%arg0: i32) -> (i32, i32) {
    %c0_i32 = arith.constant 0 : i32
    %c0_i32_0 = arith.constant 0 : i32
    %c0_i32_1 = arith.constant 0 : i32
    return %c0_i32, %c0_i32_0 : i32, i32
  }
  func.func @transform_5(%arg0: i32) -> (i32, i32) {
    %c0_i32 = arith.constant 0 : i32
    %c0_i32_0 = arith.constant 0 : i32
    %c0_i32_1 = arith.constant 0 : i32
    return %c0_i32, %c0_i32_0 : i32, i32
  }
  func.func @transform_6(%arg0: i32) -> (i32, i32) {
    %c0_i32 = arith.constant 0 : i32
    %c0_i32_0 = arith.constant 0 : i32
    %c0_i32_1 = arith.constant 0 : i32
    return %c0_i32, %c0_i32_0 : i32, i32
  }
  func.func @transform_7(%arg0: i32) -> (i32, i32) {
    %c0_i32 = arith.constant 0 : i32
    %c0_i32_0 = arith.constant 0 : i32
    %c0_i32_1 = arith.constant 0 : i32
    return %c0_i32, %c0_i32_0 : i32, i32
  }
}

module attributes {stable_mosaic.version = 11 : i64} {
  func.func @_linear_kernel(%arg0: i32, %arg1: memref<16x32xf32, #tpu.memory_space<vmem>>, %arg2: memref<32x32xf32, #tpu.memory_space<vmem>>, %arg3: memref<1x32xf32, #tpu.memory_space<vmem>>, %arg4: memref<16x32xf32, #tpu.memory_space<vmem>>) attributes {dimension_semantics = [#tpu.dimension_semantics<arbitrary>], iteration_bounds = array<i64: 1>, scalar_prefetch = 0 : i64, scratch_operands = 0 : i64, tpu.core_type = #tpu.core_type<tc>, window_params = [{pipeline_mode = #tpu.pipeline_mode<synchronous>, transform_indices = @transform_0, window_bounds = array<i64: 16, 32>}, {pipeline_mode = #tpu.pipeline_mode<synchronous>, transform_indices = @transform_1, window_bounds = array<i64: 32, 32>}, {pipeline_mode = #tpu.pipeline_mode<synchronous>, transform_indices = @transform_2, window_bounds = array<i64: 1, 32>}, {pipeline_mode = #tpu.pipeline_mode<synchronous>, transform_indices = @transform_3, window_bounds = array<i64: 16, 32>}]} {
    %c0 = arith.constant 0 : index
    %c0_0 = arith.constant 0 : index
    %0 = vector.load %arg1[%c0, %c0_0] : memref<16x32xf32, #tpu.memory_space<vmem>>, vector<16x32xf32>
    %c0_1 = arith.constant 0 : index
    %c0_2 = arith.constant 0 : index
    %1 = vector.load %arg2[%c0_1, %c0_2] : memref<32x32xf32, #tpu.memory_space<vmem>>, vector<32x32xf32>
    %cst = arith.constant dense<0.000000e+00> : vector<16x32xf32>
    %2 = tpu.matmul %0, %1, %cst {dimension_numbers = #tpu.dot_dimension_numbers<[1], [0], [0], [1], [0, 0, 1, 1], [], []>} : vector<16x32xf32>, vector<32x32xf32>, vector<16x32xf32> -> vector<16x32xf32>
    %c0_3 = arith.constant 0 : index
    %c0_4 = arith.constant 0 : index
    %3 = vector.load %arg3[%c0_3, %c0_4] : memref<1x32xf32, #tpu.memory_space<vmem>>, vector<1x32xf32>
    %4 = vector.broadcast %3 : vector<1x32xf32> to vector<16x32xf32>
    %5 = arith.addf %2, %4 : vector<16x32xf32>
    %c0_5 = arith.constant 0 : index
    %c0_6 = arith.constant 0 : index
    %6 = vector.load %arg4[%c0_5, %c0_6] : memref<16x32xf32, #tpu.memory_space<vmem>>, vector<16x32xf32>
    tpu.vector_store %arg4[%c0_5, %c0_6], %5 {strides = array<i32>} : memref<16x32xf32, #tpu.memory_space<vmem>>, vector<16x32xf32>,
    return
  }
  func.func @transform_0(%arg0: i32) -> (i32, i32) {
    %c0_i32 = arith.constant 0 : i32
    %c0_i32_0 = arith.constant 0 : i32
    %c0_i32_1 = arith.constant 0 : i32
    return %c0_i32, %c0_i32_0 : i32, i32
  }
  func.func @transform_1(%arg0: i32) -> (i32, i32) {
    %c0_i32 = arith.constant 0 : i32
    %c0_i32_0 = arith.constant 0 : i32
    %c0_i32_1 = arith.constant 0 : i32
    return %c0_i32, %c0_i32_0 : i32, i32
  }
  func.func @transform_2(%arg0: i32) -> (i32, i32) {
    %c0_i32 = arith.constant 0 : i32
    %c0_i32_0 = arith.constant 0 : i32
    %c0_i32_1 = arith.constant 0 : i32
    return %c0_i32, %c0_i32_0 : i32, i32
  }
  func.func @transform_3(%arg0: i32) -> (i32, i32) {
    %c0_i32 = arith.constant 0 : i32
    %c0_i32_0 = arith.constant 0 : i32
    %c0_i32_1 = arith.constant 0 : i32
    return %c0_i32, %c0_i32_0 : i32, i32
  }
}

</mosaic_0001>

<bundles_post_ra>
// kernel: multihead_attention_forward.3
= control target key start
LH: loop header
LB: loop body
LE: loop exit
PB: predicated region body
PF: predicated region fallthrough
CT: control target
= control target key end

     0   :  { %13 = vsyncpa [#allocation3], 0  ;;  %s387_s0 = inlined_call_operand.hbm [shape: f32[16,32], index: 0, kind: input, shape index: {}]   ;;  %s388_s1 = inlined_call_operand.hbm [shape: f32[16,32], index: 1, kind: input, shape index: {}]   ;;  %s389_s2 = inlined_call_operand.hbm [shape: f32[32,64], index: 2, kind: input, shape index: {}]   ;;  %s390_s3 = inlined_call_operand.vmem [shape: f32[1,64], index: 3, kind: input, shape index: {}]   ;;  %s391_s4 = inlined_call_operand.hbm [shape: f32[32,32], index: 4, kind: input, shape index: {}]   ;;  %s392_s5 = inlined_call_operand.vmem [shape: f32[1,32], index: 5, kind: input, shape index: {}]   ;;  %s393_s6 = inlined_call_operand.vmem [shape: f32[16,64], index: 6, kind: output, shape index: {0}]   ;;  %s394_s7 = inlined_call_operand.vmem [shape: f32[16,32], index: 7, kind: output, shape index: {1}]  }
   0x1   :  { %14 = vsyncpa [#allocation5], 0 }
   0x2   :  { %15 = vsyncpa [#allocation8], 0  ;;  %s33_s26 = sshll.u32 %s388_s1, 4  ;;  %s305_s27 = smov [#allocation4]   ;;  %s34_s26 = int_to_ptr.hbm [resolvable:$true] %s33_s26 }
   0x3   :  { %s35_s28 = sshll.u32 %s305_s27, 4  ;;  %s20_s8 = sshll.u32 %s387_s0, 4  ;;  %s36_s28 = int_to_ptr.vmem [resolvable:$true] %s35_s28  ;;  %s21_s8 = int_to_ptr.hbm [resolvable:$true] %s20_s8 }
   0x4   :  { %s306_s9 = smov 128   ;;  %s307_s10 = smov 8  }
   0x5   :  { %41 = dma.hbm_to_vmem [thread:$0]  %s34_s26, 256, %s36_s28, [#allocation5], %s306_s9, %s306_s9, %s307_s10  }
   0x6   :  { %s308_s11 = smov [#allocation2]   ;;  %s46_s15 = sshll.u32 %s389_s2, 4  ;;  %s47_s15 = int_to_ptr.hbm [resolvable:$true] %s46_s15 }
   0x7   :  { %s22_s12 = sshll.u32 %s308_s11, 4  ;;  %s61_s17 = sshll.u32 %s391_s4, 4  ;;  %s23_s12 = int_to_ptr.vmem [resolvable:$true] %s22_s12  ;;  %s62_s17 = int_to_ptr.hbm [resolvable:$true] %s61_s17 }
   0x8   :  { %28 = dma.hbm_to_vmem [thread:$0]  %s21_s8, 256, %s23_s12, [#allocation3], %s306_s9, %s306_s9, %s307_s10  }
   0x9   :  { %s309_s18 = smov [#allocation6]   ;;  %s310_s0 = smov [#allocation7]  }
   0xa   :  { %s48_s19 = sshll.u32 %s309_s18, 4  ;;  %s63_s20 = sshll.u32 %s310_s0, 4  ;;  %s49_s19 = int_to_ptr.vmem [resolvable:$true] %s48_s19  ;;  %s64_s20 = int_to_ptr.vmem [resolvable:$true] %s63_s20 }
   0xb   :  { %54 = dma.hbm_to_vmem [thread:$0]  %s47_s15, 512, %s49_s19, [#allocation5], %s306_s9, %s306_s9, %s307_s10  }
   0xc   :  { %69 = dma.hbm_to_vmem [thread:$0]  %s62_s17, 512, %s64_s20, [#allocation8], %s306_s9, %s306_s9, %s307_s10  }
   0xd   :  { %299 = dma.done.wait [#allocation3], 256  }
   0xe   :  { %300 = vsyncadd [#allocation3], 4294967040 }
   0xf   :  { %301 = dma.done.wait [#allocation5], 768  }
  0x10   :  { %302 = vsyncadd [#allocation5], 4294966528 }
  0x11   :  { %303 = dma.done.wait [#allocation8], 512  }
  0x12   :  { %304 = vsyncadd [#allocation8], 4294966784  ;;  %v93_v0 = vld [vmem:[#allocation6 + $0x18] sm:$0xff]  ;;  %v92_v2 = vld [vmem:[#allocation6 + $0x10] sm:$0xff]  ;;  %vm98_vm0 = vcmask 261120   ;;  %vm128_vm1 = vcmask 523264  }
  0x13   :  { %v136_v1 = vld [vmem:[#allocation7 + $0x18] sm:$0xff]  ;;  %187 = vmatpush.msra.mxu2 %v93_v0  ;;  %v135_v3 = vld [vmem:[#allocation7 + $0x10] sm:$0xff]  ;;  %v91_v4 = vld [vmem:[#allocation6 + $0x8] sm:$0xff]  ;;  %117 = vmatpush.msra.mxu0 %v93_v0 }
  0x14   :  { %191 = vmatpush.msra.mxu3 %v136_v1  ;;  %v134_v5 = vld [vmem:[#allocation7 + $0x8] sm:$0xff]  ;;  %159 = vmatpush.msra.mxu1 %v136_v1  ;;  %v90_v6 = vld [vmem:[#allocation6] sm:$0xff]  ;;  %v132_v9 = vld [vmem:[#allocation4 + $0x8] sm:$0xff] }
  0x15   :  { %188 = vmatpush.msra.mxu2 %v92_v2  ;;  %v133_v7 = vld [vmem:[#allocation7] sm:$0xff]  ;;  %118 = vmatpush.msra.mxu0 %v92_v2  ;;  %v89_v8 = vld [vmem:[#allocation2 + $0x8] sm:$0xff]  ;;  %v131_v11 = vld [vmem:[#allocation4] sm:$0xff] }
  0x16   :  { %192 = vmatpush.msra.mxu3 %v135_v3  ;;  %160 = vmatpush.msra.mxu1 %v135_v3  ;;  %v88_v10 = vld [vmem:[#allocation2] sm:$0xff] }
  0x17   :  { %189 = vmatpush.msra.mxu2 %v91_v4  ;;  %119 = vmatpush.msra.mxu0 %v91_v4  ;;  %v201_v12 = vld [vmem:[%s390_s3] ss:$0 sm:$0xff] }
  0x18   :  { %193 = vmatpush.msra.mxu3 %v134_v5  ;;  %161 = vmatpush.msra.mxu1 %v134_v5  ;;  %v202_v13 = vld [vmem:[%s392_s5] ss:$0 sm:$0xff] }
  0x19   :  { %190 = vmatpush.msra.mxu2 %v90_v6  ;;  %120 = vmatpush.msra.mxu0 %v90_v6 }
  0x1a   :  { %194 = vmatpush.msra.mxu3 %v133_v7  ;;  %184 = vmatmul.msk.f32.vlgmr.msra.gmra.mxu2 %vm98_vm0, %v89_v8 }
  0x1b   :  { %186 = vmatmul.msk.f32.vlgmr.msra.gmra.mxu3 %vm98_vm0, %v132_v9  ;;  %162 = vmatpush.msra.mxu1 %v133_v7 }
  0x1c   :  { %183 = vmatmul.msk.f32.vlgmr.msra.gmra.mxu0 %vm98_vm0, %v88_v10  ;;  %185 = vmatmul.msk.f32.vlgmr.msra.gmra.mxu1 %vm98_vm0, %v131_v11 }
  0x99   :  { %v122_v14 = vpop.f32.mrf.mxu0  ;;  %v164_v15 = vpop.f32.mrf.mxu1 }
  0x9a   :  { %v123_v16 = vadd.f32 %v201_v12, %v122_v14  ;;  %v165_v17 = vadd.f32 %v202_v13, %v164_v15 }
  0x9c   :  { %129 = vst.msk [vmem:[%s393_s6] sm:$0xff] %vm128_vm1, %v123_v16 }
  0x9d   :  { %v125_v18 = vpop.f32.mrf.mxu2  ;;  %170 = vst.msk [vmem:[%s394_s7] sm:$0xff] %vm98_vm0, %v165_v17 }
  0x9e   :  { %v167_v19 = vpop.f32.mrf.mxu3  ;;  %v126_v20 = vadd.f32 %v201_v12, %v125_v18 }
  0x9f   :  { %v168_v21 = vadd.f32 %v202_v13, %v167_v19 }
  0xa0   :  { %130 = vst.msk [vmem:[%s393_s6 + $0x8] sm:$0xff] %vm128_vm1, %v126_v20 }
  0xa1   :  { %171 = vst.msk [vmem:[%s394_s7 + $0x8] sm:$0xff] %vm98_vm0, %v168_v21 }
  0xa2   :  { %180 = vsyncpa [#allocation3], 1 }
  0xa3   :  { %181 = vsyncpa [#allocation5], 1 }
  0xa4   :  { %182 = vsyncpa [#allocation8], 1 }

// kernel: multihead_attention_forward.4
= control target key start
LH: loop header
LB: loop body
LE: loop exit
PB: predicated region body
PF: predicated region fallthrough
CT: control target
= control target key end

     0   :  { %vm20_vm0 = vcmask 64512   ;;  %s751_s1 = inlined_call_operand.vmem [shape: f32[8,8,8], index: 1, kind: input, shape index: {}]   ;;  %s752_s0 = inlined_call_operand.vmem [shape: f32[8,8,8], index: 0, kind: input, shape index: {}]   ;;  %s753_s2 = inlined_call_operand.vmem [shape: f32[8,8,8], index: 2, kind: input, shape index: {}]   ;;  %s754_s3 = inlined_call_operand.vmem [shape: f32[8,8,8], index: 3, kind: output, shape index: {}]  }
   0x1   :  { %v16_v0 = vld [vmem:[%s751_s1] sm:$0xff]  ;;  %v17_v1 = vld [vmem:[%s751_s1 + $0x8] sm:$0xff]  ;;  %v523_v6 = vld [vmem:[%s751_s1 + $0x10] sm:$0xff] }
   0x2   :  { %515 = vmatpush.xpose.msk.msra.mxu0 %vm20_vm0, %v16_v0  ;;  %517 = vmatpush.xpose.msk.msra.mxu1 %vm20_vm0, %v17_v1  ;;  %v14_v2 = vld [vmem:[%s752_s0] sm:$0xff]  ;;  %v15_v3 = vld [vmem:[%s752_s0 + $0x8] sm:$0xff]  ;;  %v524_v7 = vld [vmem:[%s751_s1 + $0x18] sm:$0xff] }
   0x3   :  { %v18_v4 = vld [vmem:[%s753_s2] sm:$0xff]  ;;  %v19_v5 = vld [vmem:[%s753_s2 + $0x8] sm:$0xff]  ;;  %v521_v27 = vld [vmem:[%s752_s0 + $0x10] sm:$0xff] }
   0x4   :  { %106 = vmatpush.msra.mxu2 %v18_v4  ;;  %129 = vmatpush.msra.mxu3 %v19_v5  ;;  %v537_v25 = vld [vmem:[%s751_s1 + $0x20] sm:$0xff]  ;;  %v538_v26 = vld [vmem:[%s751_s1 + $0x28] sm:$0xff]  ;;  %v522_v28 = vld [vmem:[%s752_s0 + $0x18] sm:$0xff] }
   0x5   :  { %516 = vmatmul.msk.f32.vlgmr.msra.gmra.mxu0 %vm20_vm0, %v14_v2  ;;  %518 = vmatmul.msk.f32.vlgmr.msra.gmra.mxu1 %vm20_vm0, %v15_v3  ;;  %v551_v29 = vld [vmem:[%s751_s1 + $0x30] sm:$0xff]  ;;  %v552_v30 = vld [vmem:[%s751_s1 + $0x38] sm:$0xff]  ;;  %v535_v31 = vld [vmem:[%s752_s0 + $0x20] sm:$0xff] }
   0x6   :  { %527 = vmatpush.xpose.msk.msrb.mxu2 %vm20_vm0, %v523_v6  ;;  %529 = vmatpush.xpose.msk.msrb.mxu3 %vm20_vm0, %v524_v7  ;;  %v536_v32 = vld [vmem:[%s752_s0 + $0x28] sm:$0xff]  ;;  %v549_v33 = vld [vmem:[%s752_s0 + $0x30] sm:$0xff]  ;;  %v550_v34 = vld [vmem:[%s752_s0 + $0x38] sm:$0xff] }
   0x7   :  { %v525_v37 = vld [vmem:[%s753_s2 + $0x10] sm:$0xff]  ;;  %v526_v38 = vld [vmem:[%s753_s2 + $0x18] sm:$0xff]  ;;  %v539_v44 = vld [vmem:[%s753_s2 + $0x20] sm:$0xff] }
   0x8   :  { %230 = vmatpush.msrb.mxu0 %v525_v37  ;;  %253 = vmatpush.msrb.mxu1 %v526_v38  ;;  %v540_v45 = vld [vmem:[%s753_s2 + $0x28] sm:$0xff] }
   0xa   :  { %355 = vmatpush.msra.mxu0 %v539_v44  ;;  %378 = vmatpush.msra.mxu1 %v540_v45 }
  0x82   :  { %v44_v8 = vpop.f32.mrf.mxu0  ;;  %v70_v9 = vpop.f32.mrf.mxu1 }
  0x83   :  { %v73_v10 = vsel %vm20_vm0, %v44_v8, -inf  ;;  %v74_v11 = vsel %vm20_vm0, %v70_v9, -inf }
  0x84   :  { %v75_v12 = vmax.f32 %v73_v10, %v74_v11 }
  0x86   :  { %v76_v13 = vsub.f32 %v44_v8, %v75_v12  ;;  %v77_v14 = vsub.f32 %v70_v9, %v75_v12 }
  0x88   :  { %v78_v15 = vmul.f32 1.442695, %v76_v13  ;;  %v80_v16 = vmul.f32 1.442695, %v77_v14 }
  0x8a   :  { %563 = vpow2.f32 %v78_v15 }
  0x8b   :  { %565 = vpow2.f32 %v80_v16 }
  0x90   :  { %v564_v17 = vpop.eup %563 }
  0x91   :  { %v566_v18 = vpop.eup %565  ;;  %v82_v19 = vsel %vm20_vm0, %v564_v17, 0.0 }
  0x92   :  { %v83_v20 = vsel %vm20_vm0, %v566_v18, 0.0 }
  0x93   :  { %v84_v21 = vadd.f32 %v83_v20, %v82_v19 }
  0x95   :  { %567 = vrcp.f32 %v84_v21 }
  0x9b   :  { %v568_v22 = vpop.eup %567 }
  0x9c   :  { %v86_v23 = vmul.f32 %v568_v22, %v564_v17  ;;  %v87_v24 = vmul.f32 %v568_v22, %v566_v18  ;;  %v553_v17 = vld [vmem:[%s753_s2 + $0x30] sm:$0xff]  ;;  %v554_v18 = vld [vmem:[%s753_s2 + $0x38] sm:$0xff] }
  0x9e   :  { %519 = vmatmul.msk.f32.vlgmr.msra.gmra.mxu2 %vm20_vm0, %v86_v23  ;;  %520 = vmatmul.msk.f32.vlgmr.msra.gmra.mxu3 %vm20_vm0, %v87_v24 }
  0x9f   :  { %541 = vmatpush.xpose.msk.msra.mxu2 %vm20_vm0, %v537_v25  ;;  %543 = vmatpush.xpose.msk.msra.mxu3 %vm20_vm0, %v538_v26 }
  0xa6   :  { %528 = vmatmul.msk.f32.vlgmr.msrb.gmra.mxu2 %vm20_vm0, %v521_v27  ;;  %530 = vmatmul.msk.f32.vlgmr.msrb.gmra.mxu3 %vm20_vm0, %v522_v28 }
  0xa7   :  { %555 = vmatpush.xpose.msk.msrb.mxu2 %vm20_vm0, %v551_v29  ;;  %557 = vmatpush.xpose.msk.msrb.mxu3 %vm20_vm0, %v552_v30 }
  0xae   :  { %542 = vmatmul.msk.f32.vlgmr.msra.gmra.mxu2 %vm20_vm0, %v535_v31  ;;  %544 = vmatmul.msk.f32.vlgmr.msra.gmra.mxu3 %vm20_vm0, %v536_v32 }
  0xb6   :  { %556 = vmatmul.msk.f32.vlgmr.msrb.gmra.mxu2 %vm20_vm0, %v549_v33  ;;  %558 = vmatmul.msk.f32.vlgmr.msrb.gmra.mxu3 %vm20_vm0, %v550_v34 }
 0x121   :  { %v108_v35 = vpop.f32.mrf.mxu2  ;;  %v131_v36 = vpop.f32.mrf.mxu3 }
 0x122   :  { %134 = vst.msk [vmem:[%s754_s3] sm:$0xff] %vm20_vm0, %v108_v35 }
 0x123   :  { %135 = vst.msk [vmem:[%s754_s3 + $0x8] sm:$0xff] %vm20_vm0, %v131_v36 }
 0x129   :  { %v168_v39 = vpop.f32.mrf.mxu2  ;;  %v194_v40 = vpop.f32.mrf.mxu3 }
 0x12a   :  { %v197_v41 = vsel %vm20_vm0, %v168_v39, -inf  ;;  %v198_v42 = vsel %vm20_vm0, %v194_v40, -inf }
 0x12b   :  { %v199_v43 = vmax.f32 %v197_v41, %v198_v42 }
 0x12d   :  { %v200_v46 = vsub.f32 %v168_v39, %v199_v43  ;;  %v201_v47 = vsub.f32 %v194_v40, %v199_v43 }
 0x12f   :  { %v202_v48 = vmul.f32 1.442695, %v200_v46  ;;  %v204_v49 = vmul.f32 1.442695, %v201_v47 }
 0x131   :  { %569 = vpow2.f32 %v202_v48  ;;  %v293_v50 = vpop.f32.mrf.mxu2  ;;  %v319_v51 = vpop.f32.mrf.mxu3 }
 0x132   :  { %571 = vpow2.f32 %v204_v49  ;;  %v322_v52 = vsel %vm20_vm0, %v293_v50, -inf  ;;  %v323_v53 = vsel %vm20_vm0, %v319_v51, -inf }
 0x133   :  { %v324_v54 = vmax.f32 %v322_v52, %v323_v53 }
 0x135   :  { %v325_v55 = vsub.f32 %v293_v50, %v324_v54  ;;  %v326_v56 = vsub.f32 %v319_v51, %v324_v54 }
 0x137   :  { %v570_v57 = vpop.eup %569  ;;  %v327_v58 = vmul.f32 1.442695, %v325_v55  ;;  %v329_v59 = vmul.f32 1.442695, %v326_v56 }
 0x138   :  { %v572_v60 = vpop.eup %571  ;;  %v206_v61 = vsel %vm20_vm0, %v570_v57, 0.0 }
 0x139   :  { %v207_v62 = vsel %vm20_vm0, %v572_v60, 0.0  ;;  %573 = vpow2.f32 %v327_v58  ;;  %v418_v63 = vpop.f32.mrf.mxu2  ;;  %v444_v0 = vpop.f32.mrf.mxu3 }
 0x13a   :  { %v208_v1 = vadd.f32 %v207_v62, %v206_v61  ;;  %575 = vpow2.f32 %v329_v59  ;;  %v447_v2 = vsel %vm20_vm0, %v418_v63, -inf  ;;  %v448_v3 = vsel %vm20_vm0, %v444_v0, -inf }
 0x13b   :  { %v449_v4 = vmax.f32 %v447_v2, %v448_v3 }
 0x13c   :  { %577 = vrcp.f32 %v208_v1 }
 0x13d   :  { %v450_v5 = vsub.f32 %v418_v63, %v449_v4  ;;  %v451_v6 = vsub.f32 %v444_v0, %v449_v4 }
 0x13f   :  { %v574_v7 = vpop.eup %573  ;;  %v452_v8 = vmul.f32 1.442695, %v450_v5  ;;  %v454_v9 = vmul.f32 1.442695, %v451_v6 }
 0x140   :  { %v576_v10 = vpop.eup %575  ;;  %v331_v11 = vsel %vm20_vm0, %v574_v7, 0.0 }
 0x141   :  { %v332_v12 = vsel %vm20_vm0, %v576_v10, 0.0  ;;  %579 = vpow2.f32 %v452_v8 }
 0x142   :  { %v578_v13 = vpop.eup %577  ;;  %v333_v14 = vadd.f32 %v332_v12, %v331_v11  ;;  %581 = vpow2.f32 %v454_v9 }
 0x143   :  { %v210_v15 = vmul.f32 %v578_v13, %v570_v57  ;;  %v211_v16 = vmul.f32 %v578_v13, %v572_v60 }
 0x144   :  { %583 = vrcp.f32 %v333_v14 }
 0x145   :  { %531 = vmatmul.msk.f32.vlgmr.msrb.gmra.mxu0 %vm20_vm0, %v210_v15  ;;  %532 = vmatmul.msk.f32.vlgmr.msrb.gmra.mxu1 %vm20_vm0, %v211_v16 }
 0x146   :  { %480 = vmatpush.msrb.mxu0 %v553_v17  ;;  %503 = vmatpush.msrb.mxu1 %v554_v18 }
 0x147   :  { %v580_v19 = vpop.eup %579 }
 0x148   :  { %v582_v20 = vpop.eup %581  ;;  %v456_v21 = vsel %vm20_vm0, %v580_v19, 0.0 }
 0x149   :  { %v457_v22 = vsel %vm20_vm0, %v582_v20, 0.0 }
 0x14a   :  { %v584_v23 = vpop.eup %583  ;;  %v458_v24 = vadd.f32 %v457_v22, %v456_v21 }
 0x14b   :  { %v336_v25 = vmul.f32 %v584_v23, %v576_v10  ;;  %v335_v26 = vmul.f32 %v584_v23, %v574_v7 }
 0x14c   :  { %585 = vrcp.f32 %v458_v24 }
 0x14d   :  { %545 = vmatmul.msk.f32.vlgmr.msra.gmra.mxu0 %vm20_vm0, %v335_v26  ;;  %546 = vmatmul.msk.f32.vlgmr.msra.gmra.mxu1 %vm20_vm0, %v336_v25 }
 0x152   :  { %v586_v27 = vpop.eup %585 }
 0x153   :  { %v460_v28 = vmul.f32 %v586_v27, %v580_v19  ;;  %v461_v29 = vmul.f32 %v586_v27, %v582_v20 }
 0x155   :  { %559 = vmatmul.msk.f32.vlgmr.msrb.gmra.mxu0 %vm20_vm0, %v460_v28  ;;  %560 = vmatmul.msk.f32.vlgmr.msrb.gmra.mxu1 %vm20_vm0, %v461_v29 }
 0x1c2   :  { %v232_v30 = vpop.f32.mrf.mxu0  ;;  %v255_v31 = vpop.f32.mrf.mxu1 }
 0x1c3   :  { %533 = vst.msk [vmem:[%s754_s3 + $0x10] sm:$0xff] %vm20_vm0, %v232_v30 }
 0x1c4   :  { %534 = vst.msk [vmem:[%s754_s3 + $0x18] sm:$0xff] %vm20_vm0, %v255_v31 }
 0x1ca   :  { %v357_v32 = vpop.f32.mrf.mxu0  ;;  %v380_v33 = vpop.f32.mrf.mxu1 }
 0x1cb   :  { %547 = vst.msk [vmem:[%s754_s3 + $0x20] sm:$0xff] %vm20_vm0, %v357_v32 }
 0x1cc   :  { %548 = vst.msk [vmem:[%s754_s3 + $0x28] sm:$0xff] %vm20_vm0, %v380_v33 }
 0x1d2   :  { %v482_v34 = vpop.f32.mrf.mxu0  ;;  %v505_v35 = vpop.f32.mrf.mxu1 }
 0x1d3   :  { %561 = vst.msk [vmem:[%s754_s3 + $0x30] sm:$0xff] %vm20_vm0, %v482_v34 }
 0x1d4   :  { %562 = vst.msk [vmem:[%s754_s3 + $0x38] sm:$0xff] %vm20_vm0, %v505_v35 }

// kernel: multihead_attention_forward.5
= control target key start
LH: loop header
LB: loop body
LE: loop exit
PB: predicated region body
PF: predicated region fallthrough
CT: control target
= control target key end

     0   :  { %s162_s0 = inlined_call_operand.vmem [shape: f32[16,32], index: 0, kind: input, shape index: {}]   ;;  %s163_s1 = inlined_call_operand.vmem [shape: f32[32,32], index: 1, kind: input, shape index: {}]   ;;  %s164_s2 = inlined_call_operand.vmem [shape: f32[1,32], index: 2, kind: input, shape index: {}]   ;;  %s165_s3 = inlined_call_operand.hbm [shape: f32[16,32], index: 3, kind: output, shape index: {}]  }
   0x1   :  { %v20_v0 = vld [vmem:[%s163_s1 + $0x18] sm:$0xff]  ;;  %v19_v1 = vld [vmem:[%s163_s1 + $0x10] sm:$0xff]  ;;  %v18_v2 = vld [vmem:[%s163_s1 + $0x8] sm:$0xff] }
   0x2   :  { %44 = vmatpush.msra.mxu0 %v20_v0  ;;  %77 = vmatpush.msra.mxu1 %v20_v0 }
   0x3   :  { %8 = vsyncpa [#allocation3], 0  ;;  %v17_v3 = vld [vmem:[%s163_s1] sm:$0xff]  ;;  %vm25_vm0 = vcmask 261120   ;;  %v16_v5 = vld [vmem:[%s162_s0 + $0x8] sm:$0xff]  ;;  %s111_s1 = smov [#allocation2]  }
   0x4   :  { %45 = vmatpush.msra.mxu0 %v19_v1  ;;  %78 = vmatpush.msra.mxu1 %v19_v1  ;;  %v15_v4 = vld [vmem:[%s162_s0] sm:$0xff]  ;;  %s61_s26 = sshll.u32 %s111_s1, 4  ;;  %s63_s29 = sshll.u32 %s165_s3, 4  ;;  %s62_s26 = int_to_ptr.vmem [resolvable:$true] %s61_s26  ;;  %s64_s29 = int_to_ptr.hbm [resolvable:$true] %s63_s29 }
   0x5   :  { %v84_v6 = vld [vmem:[%s164_s2] ss:$0 sm:$0xff]  ;;  %s112_s0 = smov 128   ;;  %s113_s30 = smov 8  }
   0x6   :  { %46 = vmatpush.msra.mxu0 %v18_v2  ;;  %79 = vmatpush.msra.mxu1 %v18_v2 }
   0x8   :  { %47 = vmatpush.msra.mxu0 %v17_v3  ;;  %80 = vmatpush.msra.mxu1 %v17_v3 }
   0x9   :  { %75 = vmatmul.msk.f32.vlgmr.msra.gmra.mxu0 %vm25_vm0, %v15_v4  ;;  %76 = vmatmul.msk.f32.vlgmr.msra.gmra.mxu1 %vm25_vm0, %v16_v5 }
  0x86   :  { %v49_v7 = vpop.f32.mrf.mxu0  ;;  %v52_v8 = vpop.f32.mrf.mxu1 }
  0x87   :  { %v50_v9 = vadd.f32 %v84_v6, %v49_v7  ;;  %v53_v10 = vadd.f32 %v84_v6, %v52_v8 }
  0x89   :  { %55 = vst.msk [vmem:[#allocation2] sm:$0xff] %vm25_vm0, %v50_v9 }
  0x8a   :  { %56 = vst.msk [vmem:[#allocation2 + $0x8] sm:$0xff] %vm25_vm0, %v53_v10 }
  0x8b   :  { %69 = dma.vmem_to_hbm [thread:$0]  %s62_s26, 256, %s64_s29, [#allocation3], %s112_s0, %s112_s0, %s113_s30  }
  0x8c   :  { %109 = dma.done.wait [#allocation3], 256  }
  0x8d   :  { %110 = vsyncadd [#allocation3], 4294967040 }
  0x8e   :  { %74 = vsyncpa [#allocation3], 1 }

</bundles_post_ra>
